<compile_context>
chip_gen: v7x
topology: tpu7x:2x2x1
jax: 0.10.0
libtpu: 0.0.40
codegen_flags: <defaults>
</compile_context>

<pallas_src>
import jax
import jax.numpy as jnp
from jax import lax
from jax.experimental import pallas as pl
from jax.experimental.pallas import tpu as pltpu


def _round_up(v, m):
    return ((v + m - 1) // m) * m


# ---------------------------------------------------------------------------
# Main path: MXU one-hot gather (small / medium embedding tables).
# ---------------------------------------------------------------------------
def _mf_onehot_kernel(uidx_ref, iidx_ref, u_tab_ref, i_tab_ref,
                      out_ref, u_out_ref, i_out_ref):
    # uidx_ref / iidx_ref : (1, TB) int32 index tiles (VMEM, lane-dense).
    # u_tab_ref/i_tab_ref : full embedding tables, VMEM-resident for the whole
    #                       kernel (block == whole array, so the pipeline keeps
    #                       a single buffer and never re-DMAs them).
    # out_ref             : (1, TB)  per-row dot products (lane-dense).
    # u_out_ref/i_out_ref : (TB, K)  gathered embeddings.
    tb = u_out_ref.shape[0]
    n_users = u_tab_ref.shape[0]
    n_items = i_tab_ref.shape[0]

    uidx = uidx_ref[0, :]                                     # (TB,)
    iidx = iidx_ref[0, :]

    # One-hot gather on the MXU: onehot(idx) @ table.
    u_oh = (uidx[:, None] ==
            lax.broadcasted_iota(jnp.int32, (tb, n_users), 1)
            ).astype(jnp.float32)
    i_oh = (iidx[:, None] ==
            lax.broadcasted_iota(jnp.int32, (tb, n_items), 1)
            ).astype(jnp.float32)
    u = jnp.dot(u_oh, u_tab_ref[...].astype(jnp.float32),
                preferred_element_type=jnp.float32)           # (TB, K)
    v = jnp.dot(i_oh, i_tab_ref[...].astype(jnp.float32),
                preferred_element_type=jnp.float32)           # (TB, K)

    u_out_ref[...] = u.astype(u_out_ref.dtype)
    i_out_ref[...] = v.astype(i_out_ref.dtype)
    # Row dot straight from the matmul results (no output-ref round-trip):
    # VPU multiply + XLU lane reduce, stored lane-dense.
    out_ref[...] = jnp.sum(u * v, axis=-1)[None, :].astype(out_ref.dtype)


# ---------------------------------------------------------------------------
# Fallback path: larger tables (still VMEM-resident) — unrolled scalar gather.
# ---------------------------------------------------------------------------
def _mf_gather_kernel(uidx_ref, iidx_ref, u_tab_ref, i_tab_ref,
                      out_ref, u_out_ref, i_out_ref):
    # uidx_ref / iidx_ref : SMEM scalar-prefetched index vectors (padded batch).
    tb = u_out_ref.shape[0]
    base = pl.program_id(0) * tb

    def gather(r, carry):
        u_out_ref[r, :] = u_tab_ref[uidx_ref[base + r], :]
        i_out_ref[r, :] = i_tab_ref[iidx_ref[base + r], :]
        return carry

    # unroll=8 lets the LLO scheduler co-issue several row copies per bundle
    # and amortizes the scalar-slot loop overhead.
    lax.fori_loop(0, tb, gather, 0, unroll=8)

    u = u_out_ref[...].astype(jnp.float32)
    v = i_out_ref[...].astype(jnp.float32)
    out_ref[...] = jnp.sum(u * v, axis=-1)[None, :].astype(out_ref.dtype)


_ONE_HOT_MAX_ROWS = 1024   # use the MXU one-hot gather at or below this size


def mf_forward(x, user_table, item_table, tb=None):
    """Pallas implementation of MF.forward.

    x:          (B, 2) int  [user_idx, item_idx]
    user_table: (num_users, K) float   (nn.Embedding weight)
    item_table: (num_items, K) float
    returns (out (B, 1), user_embed (B, K), item_embed (B, K))
    """
    B = x.shape[0]
    n_users, K = user_table.shape
    n_items, Ki = item_table.shape
    assert Ki == K
    itemsize = jnp.dtype(user_table.dtype).itemsize

    use_onehot = max(n_users, n_items) <= _ONE_HOT_MAX_ROWS

    # ---- batch tile --------------------------------------------------------
    if tb is None:
        tb = min(2048, _round_up(B, 128))
        # Keep >=2 grid tiles when the batch allows it so both v7x TensorCores
        # get work under dimension_semantics=("parallel",).
        if B > 128 and pl.cdiv(B, tb) < 2:
            tb = max(128, _round_up(pl.cdiv(B, 2), 128))
        if use_onehot:
            # Keep the two (tb, rows) f32 one-hot intermediates under ~8 MiB.
            cap = max(128,
                      ((8 << 20) // (8 * max(n_users, n_items))) // 128 * 128)
            tb = min(tb, cap)
    num_tiles = pl.cdiv(B, tb)
    Bp = num_tiles * tb

    user_idx = x[:, 0].astype(jnp.int32)
    item_idx = x[:, 1].astype(jnp.int32)
    if Bp != B:
        pad = Bp - B
        # Index 0 is always valid; padded rows are sliced off below.
        user_idx = jnp.pad(user_idx, (0, pad))
        item_idx = jnp.pad(item_idx, (0, pad))

    # ---- VMEM budget: sized from the device, not hard-coded ----------------
    table_bytes = (user_table.size + item_table.size) * itemsize
    # Per-step tiles, x2 for the pipeline's double buffering.
    tile_bytes = 2 * (2 * tb * 4 + 2 * tb * K * itemsize + tb * itemsize)
    onehot_bytes = (2 * tb * max(n_users, n_items) * 4) if use_onehot else 0
    try:
        vmem_cap = int(pltpu.get_tpu_info().vmem_capacity_bytes)
    except Exception:
        vmem_cap = 64 << 20            # conservative: v7x per-TensorCore VMEM
    vmem_limit = int(table_bytes + tile_bytes + onehot_bytes) + (4 << 20)
    vmem_limit = min(max(vmem_limit, 16 << 20), int(vmem_cap * 0.85))
    # TODO(synk): if table_bytes alone exceeds this budget, fall back to
    # HBM-resident tables (memory_space=pl.ANY) with a manual multi-buffered
    # per-row DMA gather instead of VMEM residency.

    out_shapes = (
        jax.ShapeDtypeStruct((num_tiles, tb), user_table.dtype),  # lane-dense dot
        jax.ShapeDtypeStruct((Bp, K), user_table.dtype),
        jax.ShapeDtypeStruct((Bp, K), item_table.dtype),
    )
    compiler_params = pltpu.CompilerParams(
        dimension_semantics=("parallel",),     # batch tiles are independent
        vmem_limit_bytes=vmem_limit,
    )
    vmem_full = pl.BlockSpec(memory_space=pltpu.MemorySpace.VMEM)

    if use_onehot:
        grid_spec = pltpu.PrefetchScalarGridSpec(
            num_scalar_prefetch=0,
            grid=(num_tiles,),
            in_specs=[
                pl.BlockSpec((1, tb), lambda t: (t, 0)),   # user idx tile
                pl.BlockSpec((1, tb), lambda t: (t, 0)),   # item idx tile
                vmem_full,                                 # user table (resident)
                vmem_full,                                 # item table (resident)
            ],
            out_specs=[
                pl.BlockSpec((1, tb), lambda t: (t, 0)),
                pl.BlockSpec((tb, K), lambda t: (t, 0)),
                pl.BlockSpec((tb, K), lambda t: (t, 0)),
            ],
        )
        out2d, u_e, i_e = pl.pallas_call(
            _mf_onehot_kernel,
            grid_spec=grid_spec,
            out_shape=out_shapes,
            compiler_params=compiler_params,
        )(user_idx.reshape(num_tiles, tb),
          item_idx.reshape(num_tiles, tb),
          user_table, item_table)
    else:
        # TODO(synk): for very large batches, chunk this pallas_call in the
        # wrapper so the SMEM scalar-prefetch index arrays stay O(tb) not O(B).
        grid_spec = pltpu.PrefetchScalarGridSpec(
            num_scalar_prefetch=2,                 # user_idx, item_idx -> SMEM
            grid=(num_tiles,),
            in_specs=[vmem_full, vmem_full],
            out_specs=[
                pl.BlockSpec((1, tb), lambda t, u, i: (t, 0)),
                pl.BlockSpec((tb, K), lambda t, u, i: (t, 0)),
                pl.BlockSpec((tb, K), lambda t, u, i: (t, 0)),
            ],
        )
        out2d, u_e, i_e = pl.pallas_call(
            _mf_gather_kernel,
            grid_spec=grid_spec,
            out_shape=out_shapes,
            compiler_params=compiler_params,
        )(user_idx, item_idx, user_table, item_table)

    out = out2d.reshape(Bp, 1)[:B]
    return out, u_e[:B], i_e[:B]


if __name__ == "__main__":
    num_users, num_items, embedding_k = 10, 12, 32
    batch = 8

    key = jax.random.PRNGKey(0)
    k_u, k_i, k_uid, k_iid = jax.random.split(key, 4)

    # Deterministic synthetic parameters (nn.Embedding weight shapes).
    user_table = (jax.random.normal(k_u, (num_users, embedding_k), jnp.float32)
                  * 0.1)
    item_table = (jax.random.normal(k_i, (num_items, embedding_k), jnp.float32)
                  * 0.1)

    # x: (B, 2) with [user_idx, item_idx]
    uids = jax.random.randint(k_uid, (batch,), 0, num_users, jnp.int32)
    iids = jax.random.randint(k_iid, (batch,), 0, num_items, jnp.int32)
    x = jnp.stack([uids, iids], axis=1)

    out, user_embed, item_embed = jax.block_until_ready(
        mf_forward(x, user_table, item_table))

    # Reference check against plain JAX semantics of the PyTorch forward.
    u_ref = user_table[uids]
    i_ref = item_table[iids]
    out_ref = jnp.sum(u_ref * i_ref, axis=1, keepdims=True)
    assert out.shape == (batch, 1)
    assert user_embed.shape == (batch, embedding_k)
    assert item_embed.shape == (batch, embedding_k)
    assert jnp.allclose(user_embed, u_ref, atol=1e-6)
    assert jnp.allclose(item_embed, i_ref, atol=1e-6)
    assert jnp.allclose(out, out_ref, atol=1e-5)

    print("KERNEL_OK")
</pallas_src>

<mosaic_0001>
module attributes {stable_mosaic.version = 11 : i64} {
  func.func @_mf_onehot_kernel(%arg0: i32, %arg1: memref<1x128xi32, #tpu.memory_space<vmem>>, %arg2: memref<1x128xi32, #tpu.memory_space<vmem>>, %arg3: memref<10x32xf32, #tpu.memory_space<vmem>>, %arg4: memref<12x32xf32, #tpu.memory_space<vmem>>, %arg5: memref<1x128xf32, #tpu.memory_space<vmem>>, %arg6: memref<128x32xf32, #tpu.memory_space<vmem>>, %arg7: memref<128x32xf32, #tpu.memory_space<vmem>>) attributes {dimension_semantics = [#tpu.dimension_semantics<parallel>], iteration_bounds = array<i64: 1>, scalar_prefetch = 0 : i64, scratch_operands = 0 : i64, tpu.core_type = #tpu.core_type<tc>, window_params = [{transform_indices = @transform_0, window_bounds = array<i64: 1, 128>}, {transform_indices = @transform_1, window_bounds = array<i64: 1, 128>}, {pipeline_mode = #tpu.pipeline_mode<synchronous>, transform_indices = @transform_2, window_bounds = array<i64: 10, 32>}, {pipeline_mode = #tpu.pipeline_mode<synchronous>, transform_indices = @transform_3, window_bounds = array<i64: 12, 32>}, {transform_indices = @transform_4, window_bounds = array<i64: 1, 128>}, {transform_indices = @transform_5, window_bounds = array<i64: 128, 32>}, {transform_indices = @transform_6, window_bounds = array<i64: 128, 32>}]} {
    %c0 = arith.constant 0 : index
    %c0_0 = arith.constant 0 : index
    %0 = vector.load %arg1[%c0, %c0_0] : memref<1x128xi32, #tpu.memory_space<vmem>>, vector<1x128xi32>
    %1 = vector.shape_cast %0 : vector<1x128xi32> to vector<128xi32>
    %c0_1 = arith.constant 0 : index
    %c0_2 = arith.constant 0 : index
    %2 = vector.load %arg2[%c0_1, %c0_2] : memref<1x128xi32, #tpu.memory_space<vmem>>, vector<1x128xi32>
    %3 = vector.shape_cast %2 : vector<1x128xi32> to vector<128xi32>
    %4 = vector.shape_cast %1 : vector<128xi32> to vector<128x1xi32>
    %5 = tpu.iota {dimensions = array<i32: 1>} : vector<128x10xi32>
    %6 = vector.broadcast %4 : vector<128x1xi32> to vector<128x10xi32>
    %7 = arith.cmpi eq, %6, %5 : vector<128x10xi32>
    %8 = arith.extui %7 : vector<128x10xi1> to vector<128x10xi32>
    %9 = arith.sitofp %8 : vector<128x10xi32> to vector<128x10xf32>
    %10 = vector.shape_cast %3 : vector<128xi32> to vector<128x1xi32>
    %11 = tpu.iota {dimensions = array<i32: 1>} : vector<128x12xi32>
    %12 = vector.broadcast %10 : vector<128x1xi32> to vector<128x12xi32>
    %13 = arith.cmpi eq, %12, %11 : vector<128x12xi32>
    %14 = arith.extui %13 : vector<128x12xi1> to vector<128x12xi32>
    %15 = arith.sitofp %14 : vector<128x12xi32> to vector<128x12xf32>
    %c0_3 = arith.constant 0 : index
    %c0_4 = arith.constant 0 : index
    %16 = vector.load %arg3[%c0_3, %c0_4] : memref<10x32xf32, #tpu.memory_space<vmem>>, vector<10x32xf32>
    %cst = arith.constant dense<0.000000e+00> : vector<128x32xf32>
    %17 = tpu.matmul %9, %16, %cst {dimension_numbers = #tpu.dot_dimension_numbers<[1], [0], [0], [1], [0, 0, 1, 1], [], []>} : vector<128x10xf32>, vector<10x32xf32>, vector<128x32xf32> -> vector<128x32xf32>
    %c0_5 = arith.constant 0 : index
    %c0_6 = arith.constant 0 : index
    %18 = vector.load %arg4[%c0_5, %c0_6] : memref<12x32xf32, #tpu.memory_space<vmem>>, vector<12x32xf32>
    %cst_7 = arith.constant dense<0.000000e+00> : vector<128x32xf32>
    %19 = tpu.matmul %15, %18, %cst_7 {dimension_numbers = #tpu.dot_dimension_numbers<[1], [0], [0], [1], [0, 0, 1, 1], [], []>} : vector<128x12xf32>, vector<12x32xf32>, vector<128x32xf32> -> vector<128x32xf32>
    %c0_8 = arith.constant 0 : index
    %c0_9 = arith.constant 0 : index
    %20 = vector.load %arg6[%c0_8, %c0_9] : memref<128x32xf32, #tpu.memory_space<vmem>>, vector<128x32xf32>
    tpu.vector_store %arg6[%c0_8, %c0_9], %17 {strides = array<i32>} : memref<128x32xf32, #tpu.memory_space<vmem>>, vector<128x32xf32>,
    %c0_10 = arith.constant 0 : index
    %c0_11 = arith.constant 0 : index
    %21 = vector.load %arg7[%c0_10, %c0_11] : memref<128x32xf32, #tpu.memory_space<vmem>>, vector<128x32xf32>
    tpu.vector_store %arg7[%c0_10, %c0_11], %19 {strides = array<i32>} : memref<128x32xf32, #tpu.memory_space<vmem>>, vector<128x32xf32>,
    %22 = arith.mulf %17, %19 : vector<128x32xf32>
    %cst_12 = arith.constant dense<0.000000e+00> : vector<128xf32>
    %23 = vector.multi_reduction <add>, %22, %cst_12 [1] : vector<128x32xf32> to vector<128xf32>
    %24 = vector.shape_cast %23 : vector<128xf32> to vector<1x128xf32>
    %c0_13 = arith.constant 0 : index
    %c0_14 = arith.constant 0 : index
    %25 = vector.load %arg5[%c0_13, %c0_14] : memref<1x128xf32, #tpu.memory_space<vmem>>, vector<1x128xf32>
    tpu.vector_store %arg5[%c0_13, %c0_14], %24 {strides = array<i32>} : memref<1x128xf32, #tpu.memory_space<vmem>>, vector<1x128xf32>,
    return
  }
  func.func @transform_0(%arg0: i32) -> (i32, i32) {
    %c0_i32 = arith.constant 0 : i32
    %c0_i32_0 = arith.constant 0 : i32
    return %arg0, %c0_i32 : i32, i32
  }
  func.func @transform_1(%arg0: i32) -> (i32, i32) {
    %c0_i32 = arith.constant 0 : i32
    %c0_i32_0 = arith.constant 0 : i32
    return %arg0, %c0_i32 : i32, i32
  }
  func.func @transform_2(%arg0: i32) -> (i32, i32) {
    %c0_i32 = arith.constant 0 : i32
    %c0_i32_0 = arith.constant 0 : i32
    %c0_i32_1 = arith.constant 0 : i32
    return %c0_i32, %c0_i32_0 : i32, i32
  }
  func.func @transform_3(%arg0: i32) -> (i32, i32) {
    %c0_i32 = arith.constant 0 : i32
    %c0_i32_0 = arith.constant 0 : i32
    %c0_i32_1 = arith.constant 0 : i32
    return %c0_i32, %c0_i32_0 : i32, i32
  }
  func.func @transform_4(%arg0: i32) -> (i32, i32) {
    %c0_i32 = arith.constant 0 : i32
    %c0_i32_0 = arith.constant 0 : i32
    return %arg0, %c0_i32 : i32, i32
  }
  func.func @transform_5(%arg0: i32) -> (i32, i32) {
    %c0_i32 = arith.constant 0 : i32
    %c0_i32_0 = arith.constant 0 : i32
    return %arg0, %c0_i32 : i32, i32
  }
  func.func @transform_6(%arg0: i32) -> (i32, i32) {
    %c0_i32 = arith.constant 0 : i32
    %c0_i32_0 = arith.constant 0 : i32
    return %arg0, %c0_i32 : i32, i32
  }
}

</mosaic_0001>

<bundles_post_ra>
// kernel: tpu_custom_call.1
= control target key start
LH: loop header
LB: loop body
LE: loop exit
PB: predicated region body
PF: predicated region fallthrough
CT: control target
= control target key end

     0   :  { %12 = vsyncpa [#allocation3], 0  ;;  %s1594_s0 = inlined_call_operand.hbm [shape: s32[1,128], index: 0, kind: input, shape index: {}]   ;;  %s1595_s1 = inlined_call_operand.vmem [shape: s32[1,128], index: 1, kind: input, shape index: {}]   ;;  %s1596_s2 = inlined_call_operand.hbm [shape: f32[10,32], index: 2, kind: input, shape index: {}]   ;;  %s1597_s3 = inlined_call_operand.hbm [shape: f32[12,32], index: 3, kind: input, shape index: {}]   ;;  %s1598_s4 = inlined_call_operand.hbm [shape: f32[1,128], index: 4, kind: output, shape index: {0}]   ;;  %s1599_s5 = inlined_call_operand.vmem [shape: f32[128,32], index: 5, kind: output, shape index: {1}]   ;;  %s1600_s6 = inlined_call_operand.vmem [shape: f32[128,32], index: 6, kind: output, shape index: {2}]  }
   0x1   :  { %13 = vsyncpa [#allocation6], 0 }
   0x2   :  { %14 = vsyncpa [#allocation4], 0  ;;  %s1216_s21 = smov [#allocation5]   ;;  %s1122_s25 = scalar_lea.hbm %s1596_s2, 256 }
   0x3   :  { %s32_s22 = sshll.u32 %s1216_s21, 4  ;;  %p1123_p0 = scmp.ne.s32.totalorder %s1596_s2, %s1122_s25  ;;  %s33_s22 = int_to_ptr.vmem [resolvable:$true] %s32_s22 }
   0x4   :  { %p1126_p1 = scmp.lt.u32.totalorder %s1122_s25, %s1596_s2 }
   0x6   :  { %p1128_p2 = pnand %p1126_p1, %p1123_p0 }
   0x8   :  { %1131 = shalt.err (!%p1128_p2)
}
   0x9   :  { %s1132_s30 = scalar_lea.vmem %s33_s22, 256  ;;  %p1137_p4 = scmp.lt.s32.totalorder %s33_s22, %s33_s22 }
   0xa   :  { %p1133_p3 = scmp.ne.s32.totalorder %s33_s22, %s1132_s30  ;;  %p1138_p5 = scmp.lt.s32.totalorder %s1132_s30, %s1132_s30 }
   0xc   :  { %p1139_p6 = por %p1138_p5, %p1137_p4 }
   0xe   :  { %p1140_p7 = pnand %p1139_p6, %p1133_p3 }
  0x10   :  { %1143 = shalt.err (!%p1140_p7)
}
  0x11   :  { %s1217_s7 = smov 128   ;;  %s1218_s8 = smov 8  }
  0x12   :  { %38 = dma.hbm_to_vmem [thread:$0]  %s1596_s2, 256, %s33_s22, [#allocation6], %s1217_s7, %s1217_s7, %s1218_s8  }
  0x13   :  { %s1219_s11 = smov [#allocation2]   ;;  %s1220_s13 = smov [#allocation7]  }
  0x14   :  { %s21_s12 = sshll.u32 %s1219_s11, 4  ;;  %s44_s14 = sshll.u32 %s1220_s13, 4  ;;  %s22_s12 = int_to_ptr.vmem [resolvable:$true] %s21_s12  ;;  %s45_s14 = int_to_ptr.vmem [resolvable:$true] %s44_s14 }
  0x15   :  { %s1144_s17 = scalar_lea.hbm %s1594_s0, 16 }
  0x16   :  { %p1145_p8 = scmp.ne.s32.totalorder %s1594_s0, %s1144_s17  ;;  %p1148_p9 = scmp.lt.u32.totalorder %s1144_s17, %s1594_s0 }
  0x18   :  { %p1150_p10 = pnand %p1148_p9, %p1145_p8 }
  0x1a   :  { %1153 = shalt.err (!%p1150_p10)
}
  0x1b   :  { %s1154_s2 = scalar_lea.vmem %s22_s12, 16  ;;  %s1158_s22 = scalar_lea.vmem %s22_s12, 32 }
  0x1c   :  { %p1155_p11 = scmp.ne.s32.totalorder %s22_s12, %s1154_s2  ;;  %p1159_p12 = scmp.lt.s32.totalorder %s22_s12, %s22_s12 }
  0x1d   :  { %p1160_p13 = scmp.lt.s32.totalorder %s1158_s22, %s1154_s2 }
  0x1f   :  { %p1161_p0 = por %p1160_p13, %p1159_p12 }
  0x21   :  { %p1162_p1 = pnand %p1161_p0, %p1155_p11 }
  0x23   :  { %1165 = shalt.err (!%p1162_p1)
}
  0x24   :  { %24 = dma.hbm_to_vmem [thread:$0]  %s1594_s0, 16, %s22_s12, [#allocation3]  }
  0x25   :  { %s1166_s27 = scalar_lea.hbm %s1597_s3, 256 }
  0x26   :  { %p1167_p2 = scmp.ne.s32.totalorder %s1597_s3, %s1166_s27  ;;  %p1170_p3 = scmp.lt.u32.totalorder %s1166_s27, %s1597_s3 }
  0x28   :  { %p1172_p4 = pnand %p1170_p3, %p1167_p2 }
  0x2a   :  { %1175 = shalt.err (!%p1172_p4)
}
  0x2b   :  { %s1176_s10 = scalar_lea.vmem %s45_s14, 256  ;;  %p1181_p6 = scmp.lt.s32.totalorder %s45_s14, %s45_s14 }
  0x2c   :  { %p1177_p5 = scmp.ne.s32.totalorder %s45_s14, %s1176_s10  ;;  %p1182_p7 = scmp.lt.s32.totalorder %s1176_s10, %s1176_s10 }
  0x2e   :  { %p1183_p8 = por %p1182_p7, %p1181_p6 }
  0x30   :  { %p1184_p9 = pnand %p1183_p8, %p1177_p5 }
  0x32   :  { %1187 = shalt.err (!%p1184_p9)
}
  0x33   :  { %50 = dma.hbm_to_vmem [thread:$0]  %s1597_s3, 256, %s45_s14, [#allocation6], %s1217_s7, %s1217_s7, %s1218_s8  }
  0x34   :  { %1210 = dma.done.wait [#allocation3], 16  }
  0x35   :  { %1211 = vsyncadd [#allocation3], 4294967280 }
  0x36   :  { %1212 = dma.done.wait [#allocation6], 512  }
  0x37   :  { %1213 = vsyncadd [#allocation6], 4294966784  ;;  %vm345_vm0 = vcmask 1041408   ;;  %v942_v0 = vld [vmem:[#allocation2] ss:$0 sm:$0xff]  ;;  %v294_v1 = vld [vmem:[#allocation5] sm:$0xff]  ;;  %v129_v8 = vlaneseq }
  0x38   :  { %vm545_vm1 = vcmask 1043456   ;;  %71 = vbcast.lane.b32.xlu1 %v942_v0, 264  ;;  %67 = vbcast.lane.b32.xlu0 %v942_v0, 256  ;;  %v295_v2 = vld [vmem:[#allocation5 + $0x8] sm:$0x3]  ;;  %vm1221_vm2 = vmmov 1  }
  0x39   :  { %vm1103_vm3 = vmpackc.low %vm345_vm0, %vm1221_vm2  ;;  %v494_v3 = vld [vmem:[#allocation7] sm:$0xff]  ;;  %v959_v4 = vld [vmem:[%s1595_s1] ss:$0 sm:$0xff]  ;;  %v1102_v5 = vpack.c.bf16 %v295_v2, %v294_v1  ;;  %v1305_v9 = vand.u32 127, %v129_v8  ;;  %vm296_vm5 = vcmask 80896   ;;  %v1222_v12 = vmov 0.0  }
  0x3a   :  { %v495_v6 = vld [vmem:[#allocation7 + $0x8] sm:$0xf]  ;;  %vm1109_vm4 = vmpackc.low %vm545_vm1, %vm1221_vm2  ;;  %vm496_vm8 = vcmask 97280  }
  0x3b   :  { %v1108_v7 = vpack.c.bf16 %v495_v6, %v494_v3  ;;  %1104 = vmatprep.subr.msk.bf16.mxu0 %vm1103_vm3, %v1102_v5 }
  0x3c   :  { %188 = vbcast.lane.b32.xlu1 %v959_v4, 264  ;;  %184 = vbcast.lane.b32.xlu0 %v959_v4, 256 }
  0x3d   :  { %1107 = vmatpush3.bf16.msk.msra.mxu0 %vm1103_vm3, %v1102_v5  ;;  %1110 = vmatprep.subr.msk.bf16.mxu1 %vm1109_vm4, %v1108_v7 }
  0x3e   :  { %1113 = vmatpush3.bf16.msk.msra.mxu1 %vm1109_vm4, %v1108_v7 }
  0x40   :  { %192 = vbcast.lane.b32.xlu1 %v959_v4, 272  ;;  %75 = vbcast.lane.b32.xlu0 %v942_v0, 272 }
  0x44   :  { %196 = vbcast.lane.b32.xlu1 %v959_v4, 280  ;;  %79 = vbcast.lane.b32.xlu0 %v942_v0, 280 }
  0x48   :  { %200 = vbcast.lane.b32.xlu1 %v959_v4, 288  ;;  %83 = vbcast.lane.b32.xlu0 %v942_v0, 288 }
  0x4c   :  { %204 = vbcast.lane.b32.xlu1 %v959_v4, 296  ;;  %87 = vbcast.lane.b32.xlu0 %v942_v0, 296 }
  0x50   :  { %208 = vbcast.lane.b32.xlu1 %v959_v4, 304  ;;  %91 = vbcast.lane.b32.xlu0 %v942_v0, 304 }
  0x54   :  { %212 = vbcast.lane.b32.xlu1 %v959_v4, 312  ;;  %95 = vbcast.lane.b32.xlu0 %v942_v0, 312 }
  0x58   :  { %216 = vbcast.lane.b32.xlu1 %v959_v4, 320  ;;  %99 = vbcast.lane.b32.xlu0 %v942_v0, 320 }
  0x5c   :  { %220 = vbcast.lane.b32.xlu1 %v959_v4, 328  ;;  %103 = vbcast.lane.b32.xlu0 %v942_v0, 328 }
  0x60   :  { %224 = vbcast.lane.b32.xlu1 %v959_v4, 336  ;;  %107 = vbcast.lane.b32.xlu0 %v942_v0, 336 }
  0x64   :  { %228 = vbcast.lane.b32.xlu1 %v959_v4, 344  ;;  %111 = vbcast.lane.b32.xlu0 %v942_v0, 344 }
  0x68   :  { %232 = vbcast.lane.b32.xlu1 %v959_v4, 352  ;;  %115 = vbcast.lane.b32.xlu0 %v942_v0, 352 }
  0x6c   :  { %236 = vbcast.lane.b32.xlu1 %v959_v4, 360  ;;  %119 = vbcast.lane.b32.xlu0 %v942_v0, 360 }
  0x70   :  { %240 = vbcast.lane.b32.xlu1 %v959_v4, 368  ;;  %123 = vbcast.lane.b32.xlu0 %v942_v0, 368 }
  0x74   :  { %244 = vbcast.lane.b32.xlu1 %v959_v4, 376  ;;  %127 = vbcast.lane.b32.xlu0 %v942_v0, 376 }
  0xaa   :  { %v72_v10 = vpop.permute.xlu1 %71  ;;  %v68_v11 = vpop.permute.xlu0 %67 }
  0xab   :  { %vm132_vm6 = vcmp.eq.s32.totalorder %v72_v10, %v1305_v9  ;;  %vm131_vm7 = vcmp.eq.s32.totalorder %v68_v11, %v1305_v9 }
  0xac   :  { %v944_v13 = vsel %vm132_vm6, 1.0, %v1222_v12  ;;  %v943_v14 = vsel %vm131_vm7, 1.0, %v1222_v12 }
  0xad   :  { %1050 = vmatprep.mubr.msk.f32.mxu0 %vm296_vm5, %v943_v14 }
  0xae   :  { %v189_v15 = vpop.permute.xlu1 %188  ;;  %1051 = vmatmul.mubr.msk.f32.vlgmr.msra.gmra.mrb[0].mxu0 %vm296_vm5, %v944_v13  ;;  %v185_v16 = vpop.permute.xlu0 %184 }
  0xaf   :  { %vm247_vm9 = vcmp.eq.s32.totalorder %v189_v15, %v1305_v9  ;;  %vm246_vm10 = vcmp.eq.s32.totalorder %v185_v16, %v1305_v9 }
  0xb0   :  { %v961_v17 = vsel %vm247_vm9, 1.0, %v1222_v12  ;;  %v960_v18 = vsel %vm246_vm10, 1.0, %v1222_v12 }
  0xb1   :  { %1078 = vmatprep.mubr.msk.f32.mxu1 %vm496_vm8, %v960_v18 }
  0xb2   :  { %v193_v19 = vpop.permute.xlu1 %192  ;;  %1079 = vmatmul.mubr.msk.f32.vlgmr.msra.gmra.mrb[0].mxu1 %vm496_vm8, %v961_v17  ;;  %v76_v20 = vpop.permute.xlu0 %75 }
  0xb3   :  { %vm248_vm11 = vcmp.eq.s32.totalorder %v193_v19, %v1305_v9  ;;  %vm133_vm12 = vcmp.eq.s32.totalorder %v76_v20, %v1305_v9 }
  0xb4   :  { %v962_v21 = vsel %vm248_vm11, 1.0, %v1222_v12  ;;  %v945_v22 = vsel %vm133_vm12, 1.0, %v1222_v12 }
  0xb5   :  { %1053 = vmatprep.mubr.msk.f32.mxu0 %vm296_vm5, %v945_v22  ;;  %1081 = vmatprep.mubr.msk.f32.mxu1 %vm496_vm8, %v962_v21 }
  0xb6   :  { %v197_v23 = vpop.permute.xlu1 %196  ;;  %v80_v24 = vpop.permute.xlu0 %79 }
  0xb7   :  { %vm249_vm13 = vcmp.eq.s32.totalorder %v197_v23, %v1305_v9  ;;  %vm134_vm14 = vcmp.eq.s32.totalorder %v80_v24, %v1305_v9 }
  0xb8   :  { %v963_v25 = vsel %vm249_vm13, 1.0, %v1222_v12  ;;  %v946_v26 = vsel %vm134_vm14, 1.0, %v1222_v12 }
  0xb9   :  { %1054 = vmatmul.mubr.msk.f32.gmra.mrb[2].mxu0 %vm296_vm5, %v946_v26  ;;  %1082 = vmatmul.mubr.msk.f32.gmra.mrb[2].mxu1 %vm496_vm8, %v963_v25 }
  0xba   :  { %v201_v27 = vpop.permute.xlu1 %200  ;;  %v84_v28 = vpop.permute.xlu0 %83 }
  0xbb   :  { %vm250_vm15 = vcmp.eq.s32.totalorder %v201_v27, %v1305_v9  ;;  %vm135_vm0 = vcmp.eq.s32.totalorder %v84_v28, %v1305_v9 }
  0xbc   :  { %v964_v29 = vsel %vm250_vm15, 1.0, %v1222_v12  ;;  %v947_v30 = vsel %vm135_vm0, 1.0, %v1222_v12 }
  0xbd   :  { %1056 = vmatprep.mubr.msk.f32.mxu0 %vm296_vm5, %v947_v30  ;;  %1084 = vmatprep.mubr.msk.f32.mxu1 %vm496_vm8, %v964_v29 }
  0xbe   :  { %v205_v31 = vpop.permute.xlu1 %204  ;;  %v88_v32 = vpop.permute.xlu0 %87 }
  0xbf   :  { %vm251_vm1 = vcmp.eq.s32.totalorder %v205_v31, %v1305_v9  ;;  %vm136_vm2 = vcmp.eq.s32.totalorder %v88_v32, %v1305_v9 }
  0xc0   :  { %v965_v33 = vsel %vm251_vm1, 1.0, %v1222_v12  ;;  %v948_v34 = vsel %vm136_vm2, 1.0, %v1222_v12 }
  0xc1   :  { %1057 = vmatmul.mubr.msk.f32.gmra.mrb[4].mxu0 %vm296_vm5, %v948_v34  ;;  %1085 = vmatmul.mubr.msk.f32.gmra.mrb[4].mxu1 %vm496_vm8, %v965_v33 }
  0xc2   :  { %v209_v35 = vpop.permute.xlu1 %208  ;;  %v92_v36 = vpop.permute.xlu0 %91 }
  0xc3   :  { %vm252_vm3 = vcmp.eq.s32.totalorder %v209_v35, %v1305_v9  ;;  %vm137_vm4 = vcmp.eq.s32.totalorder %v92_v36, %v1305_v9 }
  0xc4   :  { %v966_v37 = vsel %vm252_vm3, 1.0, %v1222_v12  ;;  %v949_v38 = vsel %vm137_vm4, 1.0, %v1222_v12 }
  0xc5   :  { %1059 = vmatprep.mubr.msk.f32.mxu0 %vm296_vm5, %v949_v38  ;;  %1087 = vmatprep.mubr.msk.f32.mxu1 %vm496_vm8, %v966_v37 }
  0xc6   :  { %v213_v39 = vpop.permute.xlu1 %212  ;;  %v96_v40 = vpop.permute.xlu0 %95 }
  0xc7   :  { %vm253_vm6 = vcmp.eq.s32.totalorder %v213_v39, %v1305_v9  ;;  %vm138_vm7 = vcmp.eq.s32.totalorder %v96_v40, %v1305_v9 }
  0xc8   :  { %v967_v41 = vsel %vm253_vm6, 1.0, %v1222_v12  ;;  %v950_v42 = vsel %vm138_vm7, 1.0, %v1222_v12 }
  0xc9   :  { %1060 = vmatmul.mubr.msk.f32.gmra.mrb[6].mxu0 %vm296_vm5, %v950_v42  ;;  %1088 = vmatmul.mubr.msk.f32.gmra.mrb[6].mxu1 %vm496_vm8, %v967_v41 }
  0xca   :  { %v217_v43 = vpop.permute.xlu1 %216  ;;  %v100_v44 = vpop.permute.xlu0 %99 }
  0xcb   :  { %vm254_vm9 = vcmp.eq.s32.totalorder %v217_v43, %v1305_v9  ;;  %vm139_vm10 = vcmp.eq.s32.totalorder %v100_v44, %v1305_v9 }
  0xcc   :  { %v968_v45 = vsel %vm254_vm9, 1.0, %v1222_v12  ;;  %v951_v46 = vsel %vm139_vm10, 1.0, %v1222_v12 }
  0xcd   :  { %1062 = vmatprep.mubr.msk.f32.mxu0 %vm296_vm5, %v951_v46  ;;  %1090 = vmatprep.mubr.msk.f32.mxu1 %vm496_vm8, %v968_v45 }
  0xce   :  { %v221_v47 = vpop.permute.xlu1 %220  ;;  %v104_v48 = vpop.permute.xlu0 %103 }
  0xcf   :  { %vm255_vm11 = vcmp.eq.s32.totalorder %v221_v47, %v1305_v9  ;;  %vm140_vm12 = vcmp.eq.s32.totalorder %v104_v48, %v1305_v9 }
  0xd0   :  { %v969_v49 = vsel %vm255_vm11, 1.0, %v1222_v12  ;;  %v952_v50 = vsel %vm140_vm12, 1.0, %v1222_v12  ;;  %vm694_vm11 = vcmask 261120   ;;  %vm830_vm12 = vcmask 261312  }
  0xd1   :  { %1063 = vmatmul.mubr.msk.f32.gmra.mrb[8].mxu0 %vm296_vm5, %v952_v50  ;;  %1091 = vmatmul.mubr.msk.f32.gmra.mrb[8].mxu1 %vm496_vm8, %v969_v49 }
  0xd2   :  { %v225_v51 = vpop.permute.xlu1 %224  ;;  %v108_v52 = vpop.permute.xlu0 %107 }
  0xd3   :  { %vm256_vm13 = vcmp.eq.s32.totalorder %v225_v51, %v1305_v9  ;;  %vm141_vm14 = vcmp.eq.s32.totalorder %v108_v52, %v1305_v9 }
  0xd4   :  { %v970_v53 = vsel %vm256_vm13, 1.0, %v1222_v12  ;;  %v953_v54 = vsel %vm141_vm14, 1.0, %v1222_v12  ;;  %vm837_vm13 = vcmask 326912   ;;  %vm844_vm14 = vcmask 392512  }
  0xd5   :  { %1065 = vmatprep.mubr.msk.f32.mxu0 %vm296_vm5, %v953_v54  ;;  %1093 = vmatprep.mubr.msk.f32.mxu1 %vm496_vm8, %v970_v53 }
  0xd6   :  { %v229_v55 = vpop.permute.xlu1 %228  ;;  %v112_v56 = vpop.permute.xlu0 %111 }
  0xd7   :  { %vm257_vm15 = vcmp.eq.s32.totalorder %v229_v55, %v1305_v9  ;;  %vm142_vm0 = vcmp.eq.s32.totalorder %v112_v56, %v1305_v9 }
  0xd8   :  { %v971_v57 = vsel %vm257_vm15, 1.0, %v1222_v12  ;;  %v954_v58 = vsel %vm142_vm0, 1.0, %v1222_v12  ;;  %vm851_vm15 = vcmask 458112   ;;  %vm858_vm0 = vcmask 523712  }
  0xd9   :  { %1066 = vmatmul.mubr.msk.f32.gmra.mrb[10].mxu0 %vm296_vm5, %v954_v58  ;;  %1094 = vmatmul.mubr.msk.f32.gmra.mrb[10].mxu1 %vm496_vm8, %v971_v57 }
  0xda   :  { %v233_v59 = vpop.permute.xlu1 %232  ;;  %v116_v60 = vpop.permute.xlu0 %115 }
  0xdb   :  { %vm258_vm1 = vcmp.eq.s32.totalorder %v233_v59, %v1305_v9  ;;  %vm143_vm2 = vcmp.eq.s32.totalorder %v116_v60, %v1305_v9 }
  0xdc   :  { %v972_v61 = vsel %vm258_vm1, 1.0, %v1222_v12  ;;  %v955_v62 = vsel %vm143_vm2, 1.0, %v1222_v12  ;;  %vm865_vm1 = vcmask 589312   ;;  %vm872_vm2 = vcmask 654912  }
  0xdd   :  { %1068 = vmatprep.mubr.msk.f32.mxu0 %vm296_vm5, %v955_v62  ;;  %1096 = vmatprep.mubr.msk.f32.mxu1 %vm496_vm8, %v972_v61 }
  0xde   :  { %v237_v63 = vpop.permute.xlu1 %236  ;;  %v120_v0 = vpop.permute.xlu0 %119 }
  0xdf   :  { %vm259_vm3 = vcmp.eq.s32.totalorder %v237_v63, %v1305_v9  ;;  %vm144_vm4 = vcmp.eq.s32.totalorder %v120_v0, %v1305_v9 }
  0xe0   :  { %v973_v1 = vsel %vm259_vm3, 1.0, %v1222_v12  ;;  %v956_v2 = vsel %vm144_vm4, 1.0, %v1222_v12  ;;  %vm879_vm3 = vcmask 720512   ;;  %vm886_vm4 = vcmask 786112  }
  0xe1   :  { %1069 = vmatmul.mubr.msk.f32.gmra.mrb[12].mxu0 %vm296_vm5, %v956_v2  ;;  %1097 = vmatmul.mubr.msk.f32.gmra.mrb[12].mxu1 %vm496_vm8, %v973_v1 }
  0xe2   :  { %v241_v3 = vpop.permute.xlu1 %240  ;;  %v124_v4 = vpop.permute.xlu0 %123 }
  0xe3   :  { %vm260_vm6 = vcmp.eq.s32.totalorder %v241_v3, %v1305_v9  ;;  %vm145_vm7 = vcmp.eq.s32.totalorder %v124_v4, %v1305_v9 }
  0xe4   :  { %v974_v5 = vsel %vm260_vm6, 1.0, %v1222_v12  ;;  %v957_v6 = vsel %vm145_vm7, 1.0, %v1222_v12  ;;  %vm893_vm6 = vcmask 851712   ;;  %vm900_vm7 = vcmask 917312  }
  0xe5   :  { %1071 = vmatprep.mubr.msk.f32.mxu0 %vm296_vm5, %v957_v6  ;;  %1099 = vmatprep.mubr.msk.f32.mxu1 %vm496_vm8, %v974_v5 }
  0xe6   :  { %v245_v7 = vpop.permute.xlu1 %244  ;;  %v128_v10 = vpop.permute.xlu0 %127 }
  0xe7   :  { %vm261_vm9 = vcmp.eq.s32.totalorder %v245_v7, %v1305_v9  ;;  %vm146_vm10 = vcmp.eq.s32.totalorder %v128_v10, %v1305_v9 }
  0xe8   :  { %v975_v11 = vsel %vm261_vm9, 1.0, %v1222_v12  ;;  %v958_v13 = vsel %vm146_vm10, 1.0, %v1222_v12  ;;  %vm907_vm9 = vcmask 982912   ;;  %vm914_vm10 = vcmask 1048512  }
  0xe9   :  { %1072 = vmatmul.mubr.msk.f32.gmra.mrb[14].mxu0 %vm296_vm5, %v958_v13  ;;  %1100 = vmatmul.mubr.msk.f32.gmra.mrb[14].mxu1 %vm496_vm8, %v975_v11  ;;  %vm816_vm5 = vcmask 130112   ;;  %vm823_vm8 = vcmask 195712  }
 0x181   :  { %v1052_v14 = vpop.f32.mrb[0].mxu0 }
 0x182   :  { %696 = vst.msk [vmem:[%s1599_s5 + $0x8] sm:$0xff] %vm694_vm11, %v1052_v14  ;;  %v415_v15 = vpop.f32.mrb[1].mxu0 }
 0x183   :  { %695 = vst.msk [vmem:[%s1599_s5] sm:$0xff] %vm694_vm11, %v415_v15 }
 0x185   :  { %v1080_v16 = vpop.f32.mrb[0].mxu1 }
 0x186   :  { %712 = vst.msk [vmem:[%s1600_s6 + $0x8] sm:$0xff] %vm694_vm11, %v1080_v16  ;;  %v728_v12 = vmul.f32 %v1080_v16, %v1052_v14  ;;  %v615_v17 = vpop.f32.mrb[1].mxu1 }
 0x187   :  { %711 = vst.msk [vmem:[%s1600_s6] sm:$0xff] %vm694_vm11, %v615_v17  ;;  %v727_v18 = vmul.f32 %v615_v17, %v415_v15  ;;  %v811_v17 = vadd.s32 4294967288, %v1305_v9 }
 0x188   :  { %v746_v19 = vsel %vm694_vm11, %v728_v12, 0.0  ;;  %v1548_v12 = vshrl.u32 %v129_v8, 7 }
 0x189   :  { %747 = vadd.xlane.f32.xlu1 %v746_v19  ;;  %v743_v20 = vsel %vm694_vm11, %v727_v18, 0.0  ;;  %v818_v19 = vadd.s32 4294967280, %v1305_v9 }
 0x18a   :  { %744 = vadd.xlane.f32.xlu0 %v743_v20  ;;  %v814_v20 = vsub.s32 %v811_v17, %v1548_v12 }
 0x18c   :  { %v1055_v21 = vpop.f32.mrb[2].mxu0  ;;  %v1083_v22 = vpop.f32.mrb[2].mxu1 }
 0x18d   :  { %698 = vst.msk [vmem:[%s1599_s5 + $0x18] sm:$0xff] %vm694_vm11, %v1055_v21  ;;  %714 = vst.msk [vmem:[%s1600_s6 + $0x18] sm:$0xff] %vm694_vm11, %v1083_v22  ;;  %v730_v23 = vmul.f32 %v1083_v22, %v1055_v21  ;;  %v425_v24 = vpop.f32.mrb[3].mxu0  ;;  %v625_v25 = vpop.f32.mrb[3].mxu1  ;;  %v809_v21 = vsub.s32 %v1305_v9, %v1548_v12 }
 0x18e   :  { %697 = vst.msk [vmem:[%s1599_s5 + $0x10] sm:$0xff] %vm694_vm11, %v425_v24  ;;  %713 = vst.msk [vmem:[%s1600_s6 + $0x10] sm:$0xff] %vm694_vm11, %v625_v25  ;;  %v729_v26 = vmul.f32 %v625_v25, %v425_v24  ;;  %v832_v24 = vadd.s32 4294967264, %v1305_v9  ;;  %v825_v25 = vadd.s32 4294967272, %v1305_v9 }
 0x18f   :  { %v752_v27 = vsel %vm694_vm11, %v730_v23, 0.0  ;;  %v821_v23 = vsub.s32 %v818_v19, %v1548_v12 }
 0x190   :  { %753 = vadd.xlane.f32.xlu0 %v752_v27  ;;  %v749_v28 = vsel %vm694_vm11, %v729_v26, 0.0 }
 0x194   :  { %v1086_v29 = vpop.f32.mrb[4].mxu1  ;;  %750 = vadd.xlane.f32.xlu0 %v749_v28  ;;  %v1058_v30 = vpop.f32.mrb[4].mxu0 }
 0x195   :  { %716 = vst.msk [vmem:[%s1600_s6 + $0x28] sm:$0xff] %vm694_vm11, %v1086_v29  ;;  %700 = vst.msk [vmem:[%s1599_s5 + $0x28] sm:$0xff] %vm694_vm11, %v1058_v30  ;;  %v732_v31 = vmul.f32 %v1086_v29, %v1058_v30  ;;  %v435_v32 = vpop.f32.mrb[5].mxu0  ;;  %v635_v33 = vpop.f32.mrb[5].mxu1  ;;  %v835_v29 = vsub.s32 %v832_v24, %v1548_v12  ;;  %v846_v30 = vadd.s32 4294967248, %v1305_v9 }
 0x196   :  { %699 = vst.msk [vmem:[%s1599_s5 + $0x20] sm:$0xff] %vm694_vm11, %v435_v32  ;;  %715 = vst.msk [vmem:[%s1600_s6 + $0x20] sm:$0xff] %vm694_vm11, %v635_v33  ;;  %v731_v34 = vmul.f32 %v635_v33, %v435_v32  ;;  %v839_v32 = vadd.s32 4294967256, %v1305_v9 }
 0x197   :  { %v758_v35 = vsel %vm694_vm11, %v732_v31, 0.0  ;;  %v828_v31 = vsub.s32 %v825_v25, %v1548_v12 }
 0x198   :  { %759 = vadd.xlane.f32.xlu0 %v758_v35  ;;  %v755_v36 = vsel %vm694_vm11, %v731_v34, 0.0 }
 0x199   :  { %756 = vadd.xlane.f32.xlu1 %v755_v36 }
 0x19c   :  { %v1061_v37 = vpop.f32.mrb[6].mxu0  ;;  %v1089_v38 = vpop.f32.mrb[6].mxu1 }
 0x19d   :  { %702 = vst.msk [vmem:[%s1599_s5 + $0x38] sm:$0xff] %vm694_vm11, %v1061_v37  ;;  %718 = vst.msk [vmem:[%s1600_s6 + $0x38] sm:$0xff] %vm694_vm11, %v1089_v38  ;;  %v734_v39 = vmul.f32 %v1089_v38, %v1061_v37  ;;  %v445_v40 = vpop.f32.mrb[7].mxu0  ;;  %v645_v41 = vpop.f32.mrb[7].mxu1  ;;  %v849_v38 = vsub.s32 %v846_v30, %v1548_v12 }
 0x19e   :  { %701 = vst.msk [vmem:[%s1599_s5 + $0x30] sm:$0xff] %vm694_vm11, %v445_v40  ;;  %717 = vst.msk [vmem:[%s1600_s6 + $0x30] sm:$0xff] %vm694_vm11, %v645_v41  ;;  %v733_v42 = vmul.f32 %v645_v41, %v445_v40  ;;  %v842_v41 = vsub.s32 %v839_v32, %v1548_v12 }
 0x19f   :  { %v764_v43 = vsel %vm694_vm11, %v734_v39, 0.0  ;;  %v860_v39 = vadd.s32 4294967232, %v1305_v9 }
 0x1a0   :  { %765 = vadd.xlane.f32.xlu0 %v764_v43  ;;  %v761_v44 = vsel %vm694_vm11, %v733_v42, 0.0  ;;  %v853_v42 = vadd.s32 4294967240, %v1305_v9 }
 0x1a1   :  { %762 = vadd.xlane.f32.xlu1 %v761_v44 }
 0x1a4   :  { %v1064_v45 = vpop.f32.mrb[8].mxu0  ;;  %v1092_v46 = vpop.f32.mrb[8].mxu1 }
 0x1a5   :  { %704 = vst.msk [vmem:[%s1599_s5 + $0x48] sm:$0xff] %vm694_vm11, %v1064_v45  ;;  %720 = vst.msk [vmem:[%s1600_s6 + $0x48] sm:$0xff] %vm694_vm11, %v1092_v46  ;;  %v736_v47 = vmul.f32 %v1092_v46, %v1064_v45  ;;  %v455_v48 = vpop.f32.mrb[9].mxu0  ;;  %v655_v49 = vpop.f32.mrb[9].mxu1 }
 0x1a6   :  { %703 = vst.msk [vmem:[%s1599_s5 + $0x40] sm:$0xff] %vm694_vm11, %v455_v48  ;;  %719 = vst.msk [vmem:[%s1600_s6 + $0x40] sm:$0xff] %vm694_vm11, %v655_v49  ;;  %v735_v50 = vmul.f32 %v655_v49, %v455_v48  ;;  %v863_v48 = vsub.s32 %v860_v39, %v1548_v12  ;;  %v874_v49 = vadd.s32 4294967216, %v1305_v9 }
 0x1a7   :  { %v770_v51 = vsel %vm694_vm11, %v736_v47, 0.0 }
 0x1a8   :  { %771 = vadd.xlane.f32.xlu0 %v770_v51  ;;  %v767_v52 = vsel %vm694_vm11, %v735_v50, 0.0  ;;  %v856_v51 = vsub.s32 %v853_v42, %v1548_v12 }
 0x1a9   :  { %768 = vadd.xlane.f32.xlu1 %v767_v52  ;;  %v867_v52 = vadd.s32 4294967224, %v1305_v9 }
 0x1ac   :  { %v1067_v53 = vpop.f32.mrb[10].mxu0  ;;  %v1095_v54 = vpop.f32.mrb[10].mxu1 }
 0x1ad   :  { %706 = vst.msk [vmem:[%s1599_s5 + $0x58] sm:$0xff] %vm694_vm11, %v1067_v53  ;;  %722 = vst.msk [vmem:[%s1600_s6 + $0x58] sm:$0xff] %vm694_vm11, %v1095_v54  ;;  %v738_v55 = vmul.f32 %v1095_v54, %v1067_v53  ;;  %v465_v56 = vpop.f32.mrb[11].mxu0  ;;  %v665_v57 = vpop.f32.mrb[11].mxu1 }
 0x1ae   :  { %705 = vst.msk [vmem:[%s1599_s5 + $0x50] sm:$0xff] %vm694_vm11, %v465_v56  ;;  %721 = vst.msk [vmem:[%s1600_s6 + $0x50] sm:$0xff] %vm694_vm11, %v665_v57  ;;  %v737_v58 = vmul.f32 %v665_v57, %v465_v56 }
 0x1af   :  { %v776_v59 = vsel %vm694_vm11, %v738_v55, 0.0 }
 0x1b0   :  { %777 = vadd.xlane.f32.xlu0 %v776_v59  ;;  %v773_v60 = vsel %vm694_vm11, %v737_v58, 0.0  ;;  %v877_v58 = vsub.s32 %v874_v49, %v1548_v12  ;;  %v888_v59 = vadd.s32 4294967200, %v1305_v9 }
 0x1b1   :  { %774 = vadd.xlane.f32.xlu1 %v773_v60 }
 0x1b4   :  { %v1070_v61 = vpop.f32.mrb[12].mxu0  ;;  %v1098_v62 = vpop.f32.mrb[12].mxu1 }
 0x1b5   :  { %708 = vst.msk [vmem:[%s1599_s5 + $0x68] sm:$0xff] %vm694_vm11, %v1070_v61  ;;  %724 = vst.msk [vmem:[%s1600_s6 + $0x68] sm:$0xff] %vm694_vm11, %v1098_v62  ;;  %v740_v63 = vmul.f32 %v1098_v62, %v1070_v61  ;;  %v475_v0 = vpop.f32.mrb[13].mxu0  ;;  %v675_v1 = vpop.f32.mrb[13].mxu1  ;;  %v870_v61 = vsub.s32 %v867_v52, %v1548_v12  ;;  %v881_v62 = vadd.s32 4294967208, %v1305_v9 }
 0x1b6   :  { %707 = vst.msk [vmem:[%s1599_s5 + $0x60] sm:$0xff] %vm694_vm11, %v475_v0  ;;  %723 = vst.msk [vmem:[%s1600_s6 + $0x60] sm:$0xff] %vm694_vm11, %v675_v1  ;;  %v739_v2 = vmul.f32 %v675_v1, %v475_v0 }
 0x1b7   :  { %v782_v3 = vsel %vm694_vm11, %v740_v63, 0.0 }
 0x1b8   :  { %783 = vadd.xlane.f32.xlu0 %v782_v3  ;;  %v779_v4 = vsel %vm694_vm11, %v739_v2, 0.0 }
 0x1b9   :  { %780 = vadd.xlane.f32.xlu1 %v779_v4  ;;  %v891_v4 = vsub.s32 %v888_v59, %v1548_v12 }
 0x1bc   :  { %v1073_v5 = vpop.f32.mrb[14].mxu0  ;;  %v1101_v6 = vpop.f32.mrb[14].mxu1 }
 0x1bd   :  { %710 = vst.msk [vmem:[%s1599_s5 + $0x78] sm:$0xff] %vm694_vm11, %v1073_v5  ;;  %726 = vst.msk [vmem:[%s1600_s6 + $0x78] sm:$0xff] %vm694_vm11, %v1101_v6  ;;  %v742_v7 = vmul.f32 %v1101_v6, %v1073_v5  ;;  %v485_v10 = vpop.f32.mrb[15].mxu0  ;;  %v685_v11 = vpop.f32.mrb[15].mxu1  ;;  %v884_v6 = vsub.s32 %v881_v62, %v1548_v12 }
 0x1be   :  { %709 = vst.msk [vmem:[%s1599_s5 + $0x70] sm:$0xff] %vm694_vm11, %v485_v10  ;;  %725 = vst.msk [vmem:[%s1600_s6 + $0x70] sm:$0xff] %vm694_vm11, %v685_v11  ;;  %v741_v13 = vmul.f32 %v685_v11, %v485_v10  ;;  %v902_v11 = vadd.s32 4294967184, %v1305_v9  ;;  %s1223_s5 = smov [#allocation8]  }
 0x1bf   :  { %v788_v14 = vsel %vm694_vm11, %v742_v7, 0.0  ;;  %v895_v7 = vadd.s32 4294967192, %v1305_v9  ;;  %s924_s6 = sshll.u32 %s1223_s5, 4  ;;  %s925_s6 = int_to_ptr.vmem [resolvable:$true] %s924_s6 }
 0x1c0   :  { %789 = vadd.xlane.f32.xlu0 %v788_v14  ;;  %v785_v15 = vsel %vm694_vm11, %v741_v13, 0.0  ;;  %v909_v14 = vadd.s32 4294967176, %v1305_v9  ;;  %s1188_s18 = scalar_lea.vmem %s925_s6, 16  ;;  %s1192_s19 = scalar_lea.vmem %s925_s6, 32 }
 0x1c1   :  { %786 = vadd.xlane.f32.xlu1 %v785_v15  ;;  %v898_v19 = vsub.s32 %v895_v7, %v1548_v12  ;;  %p1189_p10 = scmp.ne.s32.totalorder %s925_s6, %s1188_s18  ;;  %p1193_p11 = scmp.lt.s32.totalorder %s925_s6, %s925_s6 }
 0x1c2   :  { %p1194_p12 = scmp.lt.s32.totalorder %s1192_s19, %s1188_s18 }
 0x1c4   :  { %p1195_p13 = por %p1194_p12, %p1193_p11 }
 0x1c6   :  { %p1196_p0 = pnand %p1195_p13, %p1189_p10 }
 0x216   :  { %v748_v22 = vpop.xlane.xlu1 %747 }
 0x217   :  { %v745_v16 = vpop.xlane.xlu0 %744  ;;  %v815_v8 = vrot.slane %v748_v22, %v814_v20  ;;  %v905_v20 = vsub.s32 %v902_v11, %v1548_v12  ;;  %v912_v22 = vsub.s32 %v909_v14, %v1548_v12 }
 0x218   :  { %v810_v27 = vrot.slane %v745_v16, %v809_v21 }
 0x21a   :  { %v817_v34 = vsel %vm816_vm5, %v815_v8, %v810_v27 }
 0x21d   :  { %v754_v18 = vpop.xlane.xlu0 %753 }
 0x21e   :  { %v829_v40 = vrot.slane %v754_v18, %v828_v31 }
 0x221   :  { %v751_v26 = vpop.xlane.xlu0 %750 }
 0x222   :  { %v822_v28 = vrot.slane %v751_v26, %v821_v23 }
 0x224   :  { %v824_v35 = vsel %vm823_vm8, %v822_v28, %v817_v34 }
 0x225   :  { %v760_v36 = vpop.xlane.xlu0 %759  ;;  %v831_v44 = vsel %vm830_vm12, %v829_v40, %v824_v35 }
 0x226   :  { %v757_v33 = vpop.xlane.xlu1 %756  ;;  %v843_v50 = vrot.slane %v760_v36, %v842_v41 }
 0x227   :  { %v836_v37 = vrot.slane %v757_v33, %v835_v29 }
 0x229   :  { %v838_v45 = vsel %vm837_vm13, %v836_v37, %v831_v44 }
 0x22a   :  { %v845_v54 = vsel %vm844_vm14, %v843_v50, %v838_v45 }
 0x22d   :  { %v766_v46 = vpop.xlane.xlu0 %765 }
 0x22e   :  { %v763_v43 = vpop.xlane.xlu1 %762  ;;  %v857_v60 = vrot.slane %v766_v46, %v856_v51 }
 0x22f   :  { %v850_v47 = vrot.slane %v763_v43, %v849_v38 }
 0x231   :  { %v852_v55 = vsel %vm851_vm15, %v850_v47, %v845_v54 }
 0x232   :  { %v859_v0 = vsel %vm858_vm0, %v857_v60, %v852_v55 }
 0x235   :  { %v772_v56 = vpop.xlane.xlu0 %771 }
 0x236   :  { %v769_v53 = vpop.xlane.xlu1 %768  ;;  %v871_v5 = vrot.slane %v772_v56, %v870_v61 }
 0x237   :  { %v864_v57 = vrot.slane %v769_v53, %v863_v48 }
 0x239   :  { %v866_v1 = vsel %vm865_vm1, %v864_v57, %v859_v0 }
 0x23a   :  { %v873_v13 = vsel %vm872_vm2, %v871_v5, %v866_v1 }
 0x23d   :  { %v778_v2 = vpop.xlane.xlu0 %777 }
 0x23e   :  { %v775_v63 = vpop.xlane.xlu1 %774  ;;  %v885_v18 = vrot.slane %v778_v2, %v884_v6 }
 0x23f   :  { %v878_v3 = vrot.slane %v775_v63, %v877_v58 }
 0x241   :  { %v880_v15 = vsel %vm879_vm3, %v878_v3, %v873_v13 }
 0x242   :  { %v887_v21 = vsel %vm886_vm4, %v885_v18, %v880_v15 }
 0x245   :  { %v784_v16 = vpop.xlane.xlu0 %783 }
 0x246   :  { %v781_v10 = vpop.xlane.xlu1 %780  ;;  %v899_v25 = vrot.slane %v784_v16, %v898_v19 }
 0x247   :  { %v892_v17 = vrot.slane %v781_v10, %v891_v4 }
 0x249   :  { %v894_v23 = vsel %vm893_vm6, %v892_v17, %v887_v21 }
 0x24a   :  { %v901_v27 = vsel %vm900_vm7, %v899_v25, %v894_v23 }
 0x24d   :  { %v790_v24 = vpop.xlane.xlu0 %789 }
 0x24e   :  { %v787_v26 = vpop.xlane.xlu1 %786  ;;  %v913_v8 = vrot.slane %v790_v24, %v912_v22 }
 0x24f   :  { %v906_v9 = vrot.slane %v787_v26, %v905_v20 }
 0x251   :  { %v908_v28 = vsel %vm907_vm9, %v906_v9, %v901_v27 }
 0x252   :  { %v915_v29 = vsel %vm914_vm10, %v913_v8, %v908_v28 }
 0x253   :  { %917 = vst [vmem:[#allocation8] sm:$0x1] %v915_v29 }
 0x254   :  { %1199 = shalt.err (!%p1196_p0)
}
 0x255   :  { %s1200_s2 = scalar_lea.hbm %s1598_s4, 16 }
 0x256   :  { %p1201_p1 = scmp.ne.s32.totalorder %s1598_s4, %s1200_s2  ;;  %p1204_p2 = scmp.lt.u32.totalorder %s1200_s2, %s1598_s4 }
 0x258   :  { %p1206_p3 = pnand %p1204_p2, %p1201_p1 }
 0x25a   :  { %1209 = shalt.err (!%p1206_p3)
}
 0x25b   :  { %927 = dma.vmem_to_hbm [thread:$0]  %s925_s6, 16, %s1598_s4, [#allocation4]  }
 0x25c   :  { %1214 = dma.done.wait [#allocation4], 16  }
 0x25d   :  { %1215 = vsyncadd [#allocation4], 4294967280 }
 0x25e   :  { %939 = vsyncpa [#allocation3], 1 }
 0x25f   :  { %940 = vsyncpa [#allocation6], 1 }
 0x260   :  { %941 = vsyncpa [#allocation4], 1 }

</bundles_post_ra>
